<compile_context>
chip_gen: v6e
topology: v6e:2x2x1
jax: 0.10.0
libtpu: 0.0.40
codegen_flags: <defaults>
</compile_context>

<pallas_src>
import jax
import jax.numpy as jnp
from jax.experimental import pallas as pl
from jax.experimental.pallas import tpu as pltpu


def _round_up(x, m):
    return (x + m - 1) // m * m


def mlp_kernel(x_ref, w1_ref, b1_ref, w2_ref, b2_ref, w3_ref, b3_ref, o_ref):
    cd = w1_ref.dtype                      # compute dtype (bf16 or f32)
    approx_recip = (w1_ref.dtype == jnp.bfloat16)

    # fc1 + ReLU  (cast x on the VPU; MXU matmul with f32 accumulation)
    x = x_ref[...].astype(cd)
    h1 = jnp.dot(x, w1_ref[...], preferred_element_type=jnp.float32) + b1_ref[...]
    h1 = jnp.maximum(h1, 0.0)

    # dropout (eval mode) -> identity

    # fc2 + ReLU
    h2 = jnp.dot(h1.astype(cd), w2_ref[...],
                 preferred_element_type=jnp.float32) + b2_ref[...]
    h2 = jnp.maximum(h2, 0.0)

    # dropout (eval mode) -> identity

    # fc3 + softmax over the (unpadded) class axis, math in f32.
    logits = jnp.dot(h2.astype(cd), w3_ref[...],
                     preferred_element_type=jnp.float32) + b3_ref[...]
    m = jnp.max(logits, axis=-1, keepdims=True)
    e = jnp.exp(logits - m)
    denom = jnp.sum(e, axis=-1, keepdims=True)
    o_ref[...] = (e * pl.reciprocal(denom, approx=approx_recip)).astype(o_ref.dtype)


def prepare_params(params, compute_dtype=jnp.bfloat16):
    """One-time cast of weights to the compute dtype (biases stay f32)."""
    return {
        "w1": params["w1"].astype(compute_dtype),
        "b1": params["b1"].astype(jnp.float32),
        "w2": params["w2"].astype(compute_dtype),
        "b2": params["b2"].astype(jnp.float32),
        "w3": params["w3"].astype(compute_dtype),
        "b3": params["b3"].astype(jnp.float32),
    }


def _pick_batch_tile(B, batch_tile):
    bt = min(batch_tile, _round_up(B, 8))
    if B >= 4 * 256:
        # Enough rows for >= 4 grid steps at >= 256 rows/tile: feeds both v7x
        # TensorCores with >= 2 double-buffered tiles each, while v5e/v6e just
        # see a short pipelined loop.
        bt = min(bt, max(256, _round_up(pl.cdiv(B, 4), 8)))
    return max(8, _round_up(bt, 8))


def simple_mlp_forward(x, prepped, *, batch_tile=1024):
    """x: (B, n_in) float32.  prepped: output of prepare_params()."""
    B, n_in = x.shape
    hidden1 = prepped["w1"].shape[1]           # 128
    hidden2 = prepped["w2"].shape[1]           # 32
    n_classes = prepped["w3"].shape[1]         # e.g. 8

    bt = _pick_batch_tile(B, batch_tile)
    B_p = _round_up(B, bt)

    # Row-pad only if the batch doesn't divide the tile (no cast, no column pad).
    x_in = x if B_p == B else jnp.zeros((B_p, n_in), x.dtype).at[:B].set(x)

    w1, b1 = prepped["w1"], prepped["b1"]
    w2, b2 = prepped["w2"], prepped["b2"]
    w3, b3 = prepped["w3"], prepped["b3"]

    grid = (B_p // bt,)

    itemsize = jnp.dtype(w1.dtype).itemsize
    weight_bytes = ((w1.size + w2.size + w3.size) * itemsize
                    + (b1.size + b2.size + b3.size) * 4)
    cost = pl.CostEstimate(
        flops=2 * B_p * (n_in * hidden1 + hidden1 * hidden2 + hidden2 * n_classes),
        transcendentals=B_p * n_classes,
        bytes_accessed=B_p * n_in * 4 + B_p * n_classes * 4 + weight_bytes,
    )

    out = pl.pallas_call(
        mlp_kernel,
        out_shape=jax.ShapeDtypeStruct((B_p, n_classes), jnp.float32),
        grid_spec=pltpu.PrefetchScalarGridSpec(
            num_scalar_prefetch=0,
            grid=grid,
            in_specs=[
                pl.BlockSpec((bt, n_in), lambda i: (i, 0)),  # x tile (pipelined)
                pl.BlockSpec(w1.shape, lambda i: (0, 0)),    # w1 (n_in, 128)
                pl.BlockSpec(b1.shape, lambda i: (0, 0)),    # b1 (1, 128)
                pl.BlockSpec(w2.shape, lambda i: (0, 0)),    # w2 (128, 32)
                pl.BlockSpec(b2.shape, lambda i: (0, 0)),    # b2 (1, 32)
                pl.BlockSpec(w3.shape, lambda i: (0, 0)),    # w3 (32, n_classes)
                pl.BlockSpec(b3.shape, lambda i: (0, 0)),    # b3 (1, n_classes)
            ],
            out_specs=pl.BlockSpec((bt, n_classes), lambda i: (i, 0)),
        ),
        compiler_params=pltpu.CompilerParams(
            dimension_semantics=("parallel",),
            vmem_limit_bytes=32 * 1024 * 1024,
        ),
        cost_estimate=cost,
    )(x_in, w1, b1, w2, b2, w3, b3)

    return out if B_p == B else out[:B]


def init_params(key, n_in, n_classes):
    """PyTorch-style uniform(-1/sqrt(fan_in), 1/sqrt(fan_in)) init, (in,out) layout."""
    ks = jax.random.split(key, 6)

    def linear(kw, kb, fan_in, fan_out):
        bound = 1.0 / jnp.sqrt(jnp.float32(fan_in))
        w = jax.random.uniform(kw, (fan_in, fan_out), jnp.float32, -bound, bound)
        b = jax.random.uniform(kb, (1, fan_out), jnp.float32, -bound, bound)
        return w, b

    w1, b1 = linear(ks[0], ks[1], n_in, 128)
    w2, b2 = linear(ks[2], ks[3], 128, 32)
    w3, b3 = linear(ks[4], ks[5], 32, n_classes)
    return {"w1": w1, "b1": b1, "w2": w2, "b2": b2, "w3": w3, "b3": b3}


def reference_forward(x, p, compute_dtype=jnp.float32):
    """Pure-JAX reference mirroring the kernel's precision (cast matmul operands)."""
    def mm(a, w):
        return jnp.dot(a.astype(compute_dtype), w.astype(compute_dtype),
                       preferred_element_type=jnp.float32)
    h1 = jnp.maximum(mm(x, p["w1"]) + p["b1"], 0.0)
    h2 = jnp.maximum(mm(h1, p["w2"]) + p["b2"], 0.0)
    logits = mm(h2, p["w3"]) + p["b3"]
    return jax.nn.softmax(logits, axis=1)


if __name__ == "__main__":
    key = jax.random.PRNGKey(0)
    k_param, k_x1, k_x2 = jax.random.split(key, 3)

    n_in, n_classes = 64, 8
    params = init_params(k_param, n_in, n_classes)

    # --- small batch, f32 path: strict numerical check -----------------------
    prepped_f32 = prepare_params(params, jnp.float32)
    x_small = jax.random.normal(k_x1, (8, n_in), jnp.float32)
    out_f32 = jax.block_until_ready(simple_mlp_forward(x_small, prepped_f32))
    ref_f32 = reference_forward(x_small, params, jnp.float32)
    assert out_f32.shape == (8, n_classes)
    assert jnp.allclose(out_f32, ref_f32, atol=1e-5, rtol=1e-5), "f32 mismatch"
    assert jnp.allclose(jnp.sum(out_f32, axis=1), 1.0, atol=1e-5), "rows must sum to 1"

    # --- larger batch, bf16 path: multi-step pipelined "parallel" grid -------
    prepped_bf16 = prepare_params(params, jnp.bfloat16)
    x_big = jax.random.normal(k_x2, (1024, n_in), jnp.float32)
    out_bf16 = jax.block_until_ready(simple_mlp_forward(x_big, prepped_bf16))
    ref_bf16 = reference_forward(x_big, params, jnp.bfloat16)
    assert out_bf16.shape == (1024, n_classes)
    assert jnp.allclose(out_bf16, ref_bf16, atol=1e-2, rtol=2e-2), "bf16 mismatch"
    # approx reciprocal (EUP) has ~1e-3 relative error -> loosened tolerance.
    assert jnp.allclose(jnp.sum(out_bf16, axis=1), 1.0, atol=5e-3), "rows must sum to 1"

    print("KERNEL_OK")
</pallas_src>

<mosaic_0001>
module attributes {stable_mosaic.version = 11 : i64} {
  func.func @mlp_kernel(%arg0: i32, %arg1: memref<8x64xf32, #tpu.memory_space<vmem>>, %arg2: memref<64x128xf32, #tpu.memory_space<vmem>>, %arg3: memref<1x128xf32, #tpu.memory_space<vmem>>, %arg4: memref<128x32xf32, #tpu.memory_space<vmem>>, %arg5: memref<1x32xf32, #tpu.memory_space<vmem>>, %arg6: memref<32x8xf32, #tpu.memory_space<vmem>>, %arg7: memref<1x8xf32, #tpu.memory_space<vmem>>, %arg8: memref<8x8xf32, #tpu.memory_space<vmem>>) attributes {dimension_semantics = [#tpu.dimension_semantics<parallel>], iteration_bounds = array<i64: 1>, scalar_prefetch = 0 : i64, scratch_operands = 0 : i64, tpu.core_type = #tpu.core_type<tc>, window_params = [{transform_indices = @transform_0, window_bounds = array<i64: 8, 64>}, {pipeline_mode = #tpu.pipeline_mode<synchronous>, transform_indices = @transform_1, window_bounds = array<i64: 64, 128>}, {pipeline_mode = #tpu.pipeline_mode<synchronous>, transform_indices = @transform_2, window_bounds = array<i64: 1, 128>}, {pipeline_mode = #tpu.pipeline_mode<synchronous>, transform_indices = @transform_3, window_bounds = array<i64: 128, 32>}, {pipeline_mode = #tpu.pipeline_mode<synchronous>, transform_indices = @transform_4, window_bounds = array<i64: 1, 32>}, {pipeline_mode = #tpu.pipeline_mode<synchronous>, transform_indices = @transform_5, window_bounds = array<i64: 32, 8>}, {pipeline_mode = #tpu.pipeline_mode<synchronous>, transform_indices = @transform_6, window_bounds = array<i64: 1, 8>}, {transform_indices = @transform_7, window_bounds = array<i64: 8, 8>}]} {
    %c0 = arith.constant 0 : index
    %c0_0 = arith.constant 0 : index
    %0 = vector.load %arg1[%c0, %c0_0] : memref<8x64xf32, #tpu.memory_space<vmem>>, vector<8x64xf32>
    %c0_1 = arith.constant 0 : index
    %c0_2 = arith.constant 0 : index
    %1 = vector.load %arg2[%c0_1, %c0_2] : memref<64x128xf32, #tpu.memory_space<vmem>>, vector<64x128xf32>
    %cst = arith.constant dense<0.000000e+00> : vector<8x128xf32>
    %2 = tpu.matmul %0, %1, %cst {dimension_numbers = #tpu.dot_dimension_numbers<[1], [0], [0], [1], [0, 0, 1, 1], [], []>} : vector<8x64xf32>, vector<64x128xf32>, vector<8x128xf32> -> vector<8x128xf32>
    %c0_3 = arith.constant 0 : index
    %c0_4 = arith.constant 0 : index
    %3 = vector.load %arg3[%c0_3, %c0_4] : memref<1x128xf32, #tpu.memory_space<vmem>>, vector<1x128xf32>
    %4 = vector.broadcast %3 : vector<1x128xf32> to vector<8x128xf32>
    %5 = arith.addf %2, %4 : vector<8x128xf32>
    %cst_5 = arith.constant 0.000000e+00 : f32
    %6 = vector.broadcast %cst_5 : f32 to vector<8x128xf32>
    %7 = arith.maximumf %5, %6 : vector<8x128xf32>
    %c0_6 = arith.constant 0 : index
    %c0_7 = arith.constant 0 : index
    %8 = vector.load %arg4[%c0_6, %c0_7] : memref<128x32xf32, #tpu.memory_space<vmem>>, vector<128x32xf32>
    %cst_8 = arith.constant dense<0.000000e+00> : vector<8x32xf32>
    %9 = tpu.matmul %7, %8, %cst_8 {dimension_numbers = #tpu.dot_dimension_numbers<[1], [0], [0], [1], [0, 0, 1, 1], [], []>} : vector<8x128xf32>, vector<128x32xf32>, vector<8x32xf32> -> vector<8x32xf32>
    %c0_9 = arith.constant 0 : index
    %c0_10 = arith.constant 0 : index
    %10 = vector.load %arg5[%c0_9, %c0_10] : memref<1x32xf32, #tpu.memory_space<vmem>>, vector<1x32xf32>
    %11 = vector.broadcast %10 : vector<1x32xf32> to vector<8x32xf32>
    %12 = arith.addf %9, %11 : vector<8x32xf32>
    %cst_11 = arith.constant 0.000000e+00 : f32
    %13 = vector.broadcast %cst_11 : f32 to vector<8x32xf32>
    %14 = arith.maximumf %12, %13 : vector<8x32xf32>
    %c0_12 = arith.constant 0 : index
    %c0_13 = arith.constant 0 : index
    %15 = vector.load %arg6[%c0_12, %c0_13] : memref<32x8xf32, #tpu.memory_space<vmem>>, vector<32x8xf32>
    %cst_14 = arith.constant dense<0.000000e+00> : vector<8x8xf32>
    %16 = tpu.matmul %14, %15, %cst_14 {dimension_numbers = #tpu.dot_dimension_numbers<[1], [0], [0], [1], [0, 0, 1, 1], [], []>} : vector<8x32xf32>, vector<32x8xf32>, vector<8x8xf32> -> vector<8x8xf32>
    %c0_15 = arith.constant 0 : index
    %c0_16 = arith.constant 0 : index
    %17 = vector.load %arg7[%c0_15, %c0_16] : memref<1x8xf32, #tpu.memory_space<vmem>>, vector<1x8xf32>
    %18 = vector.broadcast %17 : vector<1x8xf32> to vector<8x8xf32>
    %19 = arith.addf %16, %18 : vector<8x8xf32>
    %cst_17 = arith.constant dense<0xFF800000> : vector<8xf32>
    %20 = vector.multi_reduction <maximumf>, %19, %cst_17 [1] : vector<8x8xf32> to vector<8xf32>
    %21 = vector.shape_cast %20 : vector<8xf32> to vector<8x1xf32>
    %22 = vector.broadcast %21 : vector<8x1xf32> to vector<8x8xf32>
    %23 = arith.subf %19, %22 : vector<8x8xf32>
    %24 = math.exp %23 : vector<8x8xf32>
    %cst_18 = arith.constant dense<0.000000e+00> : vector<8xf32>
    %25 = vector.multi_reduction <add>, %24, %cst_18 [1] : vector<8x8xf32> to vector<8xf32>
    %26 = vector.shape_cast %25 : vector<8xf32> to vector<8x1xf32>
    %27 = tpu.reciprocal %26 : vector<8x1xf32> -> vector<8x1xf32>
    %28 = vector.broadcast %27 : vector<8x1xf32> to vector<8x8xf32>
    %29 = arith.mulf %24, %28 : vector<8x8xf32>
    %c0_19 = arith.constant 0 : index
    %c0_20 = arith.constant 0 : index
    %30 = vector.load %arg8[%c0_19, %c0_20] : memref<8x8xf32, #tpu.memory_space<vmem>>, vector<8x8xf32>
    tpu.vector_store %arg8[%c0_19, %c0_20], %29 {strides = array<i32>} : memref<8x8xf32, #tpu.memory_space<vmem>>, vector<8x8xf32>,
    return
  }
  func.func @transform_0(%arg0: i32) -> (i32, i32) {
    %c0_i32 = arith.constant 0 : i32
    %c0_i32_0 = arith.constant 0 : i32
    return %arg0, %c0_i32 : i32, i32
  }
  func.func @transform_1(%arg0: i32) -> (i32, i32) {
    %c0_i32 = arith.constant 0 : i32
    %c0_i32_0 = arith.constant 0 : i32
    %c0_i32_1 = arith.constant 0 : i32
    return %c0_i32, %c0_i32_0 : i32, i32
  }
  func.func @transform_2(%arg0: i32) -> (i32, i32) {
    %c0_i32 = arith.constant 0 : i32
    %c0_i32_0 = arith.constant 0 : i32
    %c0_i32_1 = arith.constant 0 : i32
    return %c0_i32, %c0_i32_0 : i32, i32
  }
  func.func @transform_3(%arg0: i32) -> (i32, i32) {
    %c0_i32 = arith.constant 0 : i32
    %c0_i32_0 = arith.constant 0 : i32
    %c0_i32_1 = arith.constant 0 : i32
    return %c0_i32, %c0_i32_0 : i32, i32
  }
  func.func @transform_4(%arg0: i32) -> (i32, i32) {
    %c0_i32 = arith.constant 0 : i32
    %c0_i32_0 = arith.constant 0 : i32
    %c0_i32_1 = arith.constant 0 : i32
    return %c0_i32, %c0_i32_0 : i32, i32
  }
  func.func @transform_5(%arg0: i32) -> (i32, i32) {
    %c0_i32 = arith.constant 0 : i32
    %c0_i32_0 = arith.constant 0 : i32
    %c0_i32_1 = arith.constant 0 : i32
    return %c0_i32, %c0_i32_0 : i32, i32
  }
  func.func @transform_6(%arg0: i32) -> (i32, i32) {
    %c0_i32 = arith.constant 0 : i32
    %c0_i32_0 = arith.constant 0 : i32
    %c0_i32_1 = arith.constant 0 : i32
    return %c0_i32, %c0_i32_0 : i32, i32
  }
  func.func @transform_7(%arg0: i32) -> (i32, i32) {
    %c0_i32 = arith.constant 0 : i32
    %c0_i32_0 = arith.constant 0 : i32
    return %arg0, %c0_i32 : i32, i32
  }
}

</mosaic_0001>

<bundles_post_ra>
// kernel: tpu_custom_call.1
= control target key start
LH: loop header
LB: loop body
LE: loop exit
PB: predicated region body
PF: predicated region fallthrough
CT: control target
= control target key end

     0   :  { %v454_v1 = vmov 0.0   ;;  %vm455_vm0 = vmmov 0   ;;  %s633_s0 = inlined_call_operand.vmem [shape: f32[8,64], index: 0, kind: input, shape index: {}]   ;;  %s634_s1 = inlined_call_operand.vmem [shape: f32[64,128], index: 1, kind: input, shape index: {}]   ;;  %s635_s2 = inlined_call_operand.vmem [shape: f32[1,128], index: 2, kind: input, shape index: {}]   ;;  %s636_s3 = inlined_call_operand.vmem [shape: f32[128,32], index: 3, kind: input, shape index: {}]   ;;  %s637_s4 = inlined_call_operand.vmem [shape: f32[1,32], index: 4, kind: input, shape index: {}]   ;;  %s638_s5 = inlined_call_operand.vmem [shape: f32[32,8], index: 5, kind: input, shape index: {}]   ;;  %s639_s6 = inlined_call_operand.vmem [shape: f32[1,8], index: 6, kind: input, shape index: {}]   ;;  %s640_s7 = inlined_call_operand.hbm [shape: f32[8,8], index: 7, kind: output, shape index: {}]  }
   0x1   :  { %v35_v0 = vld [vmem:[%s634_s1 + $0x38] sm:$0xff]  ;;  %360 = vmatprep.subr.mxu0 %v454_v1  ;;  %v34_v2 = vld [vmem:[%s634_s1 + $0x30] sm:$0xff]  ;;  %376 = vmatprep.mubr.msk.f32.mxu0 %vm455_vm0, %v454_v1  ;;  %v33_v3 = vld [vmem:[%s634_s1 + $0x28] sm:$0xff] }
   0x2   :  { %361 = vmatpush3.msra.mxu0 %v35_v0  ;;  %379 = vmatprep.subr.mxu1 %v454_v1  ;;  %v133_v4 = vld [vmem:[%s636_s3 + $0x78] sm:$0xff]  ;;  %v132_v5 = vld [vmem:[%s636_s3 + $0x70] sm:$0xff]  ;;  %v32_v6 = vld [vmem:[%s634_s1 + $0x20] sm:$0xff] }
   0x3   :  { %362 = vmatprep.subr.mxu0 %v454_v1  ;;  %411 = vmatprep.mubr.msk.f32.mxu1 %vm455_vm0, %v454_v1  ;;  %v131_v7 = vld [vmem:[%s636_s3 + $0x68] sm:$0xff]  ;;  %v31_v8 = vld [vmem:[%s634_s1 + $0x18] sm:$0xff]  ;;  %v130_v9 = vld [vmem:[%s636_s3 + $0x60] sm:$0xff] }
   0x4   :  { %363 = vmatpush3.msra.mxu0 %v34_v2  ;;  %380 = vmatpush3.msra.mxu1 %v133_v4 }
   0x5   :  { %364 = vmatprep.subr.mxu0 %v454_v1  ;;  %381 = vmatprep.subr.mxu1 %v454_v1 }
   0x6   :  { %365 = vmatpush3.msra.mxu0 %v33_v3  ;;  %382 = vmatpush3.msra.mxu1 %v132_v5 }
   0x7   :  { %366 = vmatprep.subr.mxu0 %v454_v1  ;;  %383 = vmatprep.subr.mxu1 %v454_v1 }
   0x8   :  { %12 = vsyncpa [#allocation3], 0  ;;  %367 = vmatpush3.msra.mxu0 %v32_v6  ;;  %384 = vmatpush3.msra.mxu1 %v131_v7  ;;  %v30_v10 = vld [vmem:[%s634_s1 + $0x10] sm:$0xff]  ;;  %v129_v11 = vld [vmem:[%s636_s3 + $0x58] sm:$0xff]  ;;  %vm43_vm1 = vcmask 523264   ;;  %vm223_vm2 = vcmask 261120  }
   0x9   :  { %368 = vmatprep.subr.mxu0 %v454_v1  ;;  %385 = vmatprep.subr.mxu1 %v454_v1  ;;  %v29_v12 = vld [vmem:[%s634_s1 + $0x8] sm:$0xff]  ;;  %v128_v13 = vld [vmem:[%s636_s3 + $0x50] sm:$0xff]  ;;  %v28_v14 = vld [vmem:[%s634_s1] sm:$0xff]  ;;  %vm297_vm3 = vcmask 64512  }
   0xa   :  { %369 = vmatpush3.msra.mxu0 %v31_v8  ;;  %386 = vmatpush3.msra.mxu1 %v130_v9  ;;  %v127_v15 = vld [vmem:[%s636_s3 + $0x48] sm:$0xff]  ;;  %v27_v16 = vld [vmem:[%s633_s0] sm:$0xff]  ;;  %v125_v18 = vld [vmem:[%s636_s3 + $0x38] sm:$0xff] }
   0xb   :  { %370 = vmatprep.subr.mxu0 %v454_v1  ;;  %387 = vmatprep.subr.mxu1 %v454_v1  ;;  %v126_v17 = vld [vmem:[%s636_s3 + $0x40] sm:$0xff]  ;;  %v124_v19 = vld [vmem:[%s636_s3 + $0x30] sm:$0xff]  ;;  %v123_v20 = vld [vmem:[%s636_s3 + $0x28] sm:$0xff] }
   0xc   :  { %371 = vmatpush3.msra.mxu0 %v30_v10  ;;  %388 = vmatpush3.msra.mxu1 %v129_v11  ;;  %v122_v21 = vld [vmem:[%s636_s3 + $0x20] sm:$0xff]  ;;  %v121_v22 = vld [vmem:[%s636_s3 + $0x18] sm:$0xff]  ;;  %v120_v23 = vld [vmem:[%s636_s3 + $0x10] sm:$0xff] }
   0xd   :  { %372 = vmatprep.subr.mxu0 %v454_v1  ;;  %389 = vmatprep.subr.mxu1 %v454_v1  ;;  %v119_v24 = vld [vmem:[%s636_s3 + $0x8] sm:$0xff]  ;;  %v118_v25 = vld [vmem:[%s636_s3] sm:$0xff]  ;;  %v215_v26 = vld [vmem:[%s638_s5 + $0x18] sm:$0xff] }
   0xe   :  { %373 = vmatpush3.msra.mxu0 %v29_v12  ;;  %390 = vmatpush3.msra.mxu1 %v128_v13  ;;  %v324_v27 = vld [vmem:[%s635_s2] ss:$0 sm:$0xff]  ;;  %v214_v32 = vld [vmem:[%s638_s5 + $0x10] sm:$0xff]  ;;  %v213_v33 = vld [vmem:[%s638_s5 + $0x8] sm:$0xff] }
   0xf   :  { %374 = vmatprep.subr.mxu0 %v454_v1  ;;  %391 = vmatprep.subr.mxu1 %v454_v1  ;;  %v212_v34 = vld [vmem:[%s638_s5] sm:$0xff] }
  0x10   :  { %375 = vmatpush3.msra.mxu0 %v28_v14  ;;  %392 = vmatpush3.msra.mxu1 %v127_v15  ;;  %v326_v35 = vld [vmem:[%s637_s4] ss:$0 sm:$0xff]  ;;  %s456_s4 = smov [#allocation2]  }
  0x11   :  { %377 = vmatmul.mubr.msk.f32.vlgmr.msra.gmra.mxu0 %vm43_vm1, %v27_v16  ;;  %393 = vmatprep.subr.mxu1 %v454_v1  ;;  %v327_v40 = vld [vmem:[%s639_s6] ss:$0 sm:$0xff]  ;;  %s316_s5 = sshll.u32 %s456_s4, 4  ;;  %s317_s5 = int_to_ptr.vmem [resolvable:$true] %s316_s5 }
  0x12   :  { %394 = vmatpush3.msra.mxu1 %v126_v17  ;;  %414 = vmatprep.subr.mxu0 %v454_v1  ;;  %s432_s6 = scalar_lea.vmem %s317_s5, 128  ;;  %p437_p1 = scmp.lt.s32.totalorder %s317_s5, %s317_s5 }
  0x13   :  { %395 = vmatprep.subr.mxu1 %v454_v1  ;;  %422 = vmatprep.mubr.msk.f32.mxu0 %vm455_vm0, %v454_v1  ;;  %p433_p0 = scmp.ne.s32.totalorder %s317_s5, %s432_s6  ;;  %p438_p2 = scmp.lt.s32.totalorder %s432_s6, %s432_s6 }
  0x14   :  { %396 = vmatpush3.msra.mxu1 %v125_v18  ;;  %415 = vmatpush3.msra.mxu0 %v215_v26 }
  0x15   :  { %397 = vmatprep.subr.mxu1 %v454_v1  ;;  %416 = vmatprep.subr.mxu0 %v454_v1  ;;  %p439_p3 = por %p438_p2, %p437_p1 }
  0x16   :  { %398 = vmatpush3.msra.mxu1 %v124_v19  ;;  %417 = vmatpush3.msra.mxu0 %v214_v32 }
  0x17   :  { %399 = vmatprep.subr.mxu1 %v454_v1  ;;  %418 = vmatprep.subr.mxu0 %v454_v1  ;;  %p440_p4 = pnand %p439_p3, %p433_p0 }
  0x18   :  { %400 = vmatpush3.msra.mxu1 %v123_v20  ;;  %419 = vmatpush3.msra.mxu0 %v213_v33 }
  0x19   :  { %401 = vmatprep.subr.mxu1 %v454_v1  ;;  %420 = vmatprep.subr.mxu0 %v454_v1 }
  0x1a   :  { %402 = vmatpush3.msra.mxu1 %v122_v21  ;;  %421 = vmatpush3.msra.mxu0 %v212_v34 }
  0x1b   :  { %403 = vmatprep.subr.mxu1 %v454_v1 }
  0x1c   :  { %404 = vmatpush3.msra.mxu1 %v121_v22 }
  0x1d   :  { %405 = vmatprep.subr.mxu1 %v454_v1 }
  0x1e   :  { %406 = vmatpush3.msra.mxu1 %v120_v23 }
  0x1f   :  { %407 = vmatprep.subr.mxu1 %v454_v1 }
  0x20   :  { %408 = vmatpush3.msra.mxu1 %v119_v24 }
  0x21   :  { %409 = vmatprep.subr.mxu1 %v454_v1 }
  0x22   :  { %410 = vmatpush3.msra.mxu1 %v118_v25 }
  0xd1   :  { %v113_v28 = vpop.f32.mrf.mxu0 }
  0xd2   :  { %v114_v29 = vadd.f32 %v324_v27, %v113_v28 }
  0xd3   :  { %v378_v30 = vpop.f32.mrf.mxu0 }
  0xd4   :  { %v117_v31 = vmax.f32 %v114_v29, 0.0 }
  0xd6   :  { %412 = vmatmul.mubr.f32.vlgmr.msra.gmra.mxu1 %v117_v31 }
 0x196   :  { %v207_v36 = vpop.f32.mrf.mxu1 }
 0x197   :  { %v208_v37 = vadd.f32 %v326_v35, %v207_v36 }
 0x198   :  { %v413_v38 = vpop.f32.mrf.mxu1 }
 0x199   :  { %v211_v39 = vmax.f32 %v208_v37, 0.0 }
 0x19b   :  { %423 = vmatmul.mubr.msk.f32.vlgmr.msra.gmra.mxu0 %vm223_vm2, %v211_v39 }
 0x25b   :  { %v293_v41 = vpop.f32.mrf.mxu0 }
 0x25c   :  { %v294_v42 = vadd.f32 %v327_v40, %v293_v41 }
 0x25d   :  { %v424_v43 = vpop.f32.mrf.mxu0 }
 0x25e   :  { %v298_v44 = vsel %vm297_vm3, %v294_v42, -inf }
 0x25f   :  { %299 = vmax.xlane.f32.xlu0 %v298_v44 }
 0x2e8   :  { %v300_v45 = vpop.xlane.xlu0 %299 }
 0x2e9   :  { %v301_v46 = vsub.f32 %v294_v42, %v300_v45 }
 0x2eb   :  { %v302_v47 = vmul.f32 1.442695, %v301_v46 }
 0x2ed   :  { %428 = vpow2.f32 %v302_v47 }
 0x2fa   :  { %v429_v48 = vpop.eup %428 }
 0x2fb   :  { %v304_v49 = vsel %vm297_vm3, %v429_v48, 0.0 }
 0x2fc   :  { %305 = vadd.xlane.f32.xlu0 %v304_v49 }
 0x385   :  { %v306_v50 = vpop.xlane.xlu0 %305 }
 0x386   :  { %430 = vrcp.f32 %v306_v50 }
 0x393   :  { %v431_v51 = vpop.eup %430 }
 0x394   :  { %v308_v52 = vmul.f32 %v431_v51, %v429_v48 }
 0x396   :  { %309 = vst.msk [vmem:[#allocation2] sm:$0xff] %vm297_vm3, %v308_v52 }
 0x397   :  { %443 = shalt.err (!%p440_p4)
}
 0x398   :  { %319 = dma.vmem_to_hbm [thread:$0]  %s317_s5, 128, %s640_s7, [#allocation3]  }
 0x399   :  { %452 = dma.done.wait [#allocation3], 128  }
 0x39a   :  { %453 = vsyncadd [#allocation3], 4294967168 }
 0x39b   :  { %323 = vsyncpa [#allocation3], 1 }

</bundles_post_ra>
